<compile_context>
chip_gen: v5e
topology: v5e:2x2
jax: 0.10.0
libtpu: 0.0.40
codegen_flags: <defaults>
</compile_context>

<pallas_src>
import functools

import jax
import jax.numpy as jnp
from jax.experimental import pallas as pl
from jax.experimental.pallas import tpu as pltpu


def _round_up(n, m):
    return ((n + m - 1) // m) * m


def _mlp_kernel(x_ref, w1_ref, b1_ref, w2_ref, b2_ref, w3_ref, b3_ref, o_ref,
                *, hidden, n_out):
    # x_ref: (2, TB) VMEM block.  o_ref: (n_out, TB) VMEM block.
    # w*/b* refs: tiny SMEM arrays, read as scalars (splatted onto the VPU).
    x0 = x_ref[0:1, :]                                   # (1, TB)
    x1 = x_ref[1:2, :]                                   # (1, TB)

    # Layer 1: 2 -> hidden  (two scalar-weight FMAs per hidden unit) + ReLU.
    h1 = []
    for j in range(hidden):
        v = x0 * w1_ref[0, j] + x1 * w1_ref[1, j] + b1_ref[0, j]
        h1.append(jnp.maximum(v, 0.0))

    # Layer 2: hidden -> hidden + ReLU.
    h2 = []
    for j in range(hidden):
        v = h1[0] * w2_ref[0, j]
        for k in range(1, hidden):
            v = v + h1[k] * w2_ref[k, j]
        h2.append(jnp.maximum(v + b2_ref[0, j], 0.0))

    # Layer 3: hidden -> n_out, no activation; lane-dense row stores.
    for j in range(n_out):
        v = h2[0] * w3_ref[0, j]
        for k in range(1, hidden):
            v = v + h2[k] * w3_ref[k, j]
        o_ref[j:j + 1, :] = v + b3_ref[0, j]


@functools.partial(jax.jit, static_argnames=("block_rows",))
def linear_nn_complex_forward(x, w1, b1, w2, b2, w3, b3, *, block_rows=8192):
    """x: (B, 2) float32 -> (B, 3) float32.  Parameters are the raw (unpadded)
    module parameters: w1 (2,l), b1 (l,), w2 (l,l), b2 (l,), w3 (l,3), b3 (3,)."""
    B = x.shape[0]
    l = w1.shape[1]
    n_out = w3.shape[1]

    # Lane-aligned padded batch and batch tile (both multiples of 128).
    Bp = _round_up(max(B, 1), 128)
    TB = min(_round_up(block_rows, 128), Bp)
    if Bp >= 256:                          # give v7x megacore >= 2 grid steps
        TB = min(TB, max(128, (Bp // 2) // 128 * 128))
    steps = -(-Bp // TB)
    Bp = steps * TB

    # Feature-major, batch-on-lanes: (2, Bp) in, (n_out, Bp) out.
    xt = jnp.transpose(x).astype(jnp.float32)            # (2, B)
    if Bp != B:                                           # pad only when needed
        xt = jnp.pad(xt, ((0, 0), (0, Bp - B)))

    # Tiny parameters -> 2-D SMEM operands, read as scalars inside the kernel.
    w1s = w1.astype(jnp.float32)                          # (2, l)
    w2s = w2.astype(jnp.float32)                          # (l, l)
    w3s = w3.astype(jnp.float32)                          # (l, n_out)
    b1s = b1.reshape(1, l).astype(jnp.float32)
    b2s = b2.reshape(1, l).astype(jnp.float32)
    b3s = b3.reshape(1, n_out).astype(jnp.float32)

    smem = pl.BlockSpec(memory_space=pltpu.MemorySpace.SMEM)

    out_t = pl.pallas_call(
        functools.partial(_mlp_kernel, hidden=l, n_out=n_out),
        out_shape=jax.ShapeDtypeStruct((n_out, Bp), jnp.float32),
        grid=(steps,),
        in_specs=[
            pl.BlockSpec((2, TB), lambda i: (0, i)),      # activations, lane-dense
            smem, smem, smem, smem, smem, smem,           # weights / biases (SMEM)
        ],
        out_specs=pl.BlockSpec((n_out, TB), lambda i: (0, i)),
        compiler_params=pltpu.CompilerParams(
            dimension_semantics=("parallel",),            # megacore sharding on v7x
        ),
    )(xt, w1s, b1s, w2s, b2s, w3s, b3s)

    out = jnp.transpose(out_t)                            # (Bp, n_out)
    return out[:B] if Bp != B else out


def init_params(key, l=4):
    """Deterministic synthetic init matching LinearNNComplex(l) shapes."""
    k1, k2, k3, k4, k5, k6 = jax.random.split(key, 6)
    w1 = jax.random.normal(k1, (2, l), jnp.float32) * 0.5
    b1 = jax.random.normal(k2, (l,), jnp.float32) * 0.1
    w2 = jax.random.normal(k3, (l, l), jnp.float32) * 0.5
    b2 = jax.random.normal(k4, (l,), jnp.float32) * 0.1
    w3 = jax.random.normal(k5, (l, 3), jnp.float32) * 0.5
    b3 = jax.random.normal(k6, (3,), jnp.float32) * 0.1
    return w1, b1, w2, b2, w3, b3


def reference_forward(x, w1, b1, w2, b2, w3, b3):
    hp = jax.lax.Precision.HIGHEST
    h = jnp.maximum(jnp.dot(x, w1, precision=hp) + b1, 0.0)
    h = jnp.maximum(jnp.dot(h, w2, precision=hp) + b2, 0.0)
    return jnp.dot(h, w3, precision=hp) + b3


if __name__ == "__main__":
    key = jax.random.PRNGKey(0)
    kx, kx2, kx3, kp = jax.random.split(key, 4)

    l = 4
    params = init_params(kp, l=l)

    # Small case (batch padded up to one lane-aligned tile).
    x = jax.random.normal(kx, (8, 2), jnp.float32)
    out = jax.block_until_ready(linear_nn_complex_forward(x, *params))
    ref = reference_forward(x, *params)
    assert out.shape == (8, 3), out.shape
    assert jnp.allclose(out, ref, atol=1e-5, rtol=1e-5)

    # Multi-tile ragged case (exercises batch padding + 3-step parallel grid).
    x2 = jax.random.normal(kx2, (300, 2), jnp.float32)
    out2 = jax.block_until_ready(
        linear_nn_complex_forward(x2, *params, block_rows=128)
    )
    ref2 = reference_forward(x2, *params)
    assert out2.shape == (300, 3), out2.shape
    assert jnp.allclose(out2, ref2, atol=1e-5, rtol=1e-5)

    # Lane-aligned case (exercises the no-pad / no-slice fast path, 2 grid steps).
    x3 = jax.random.normal(kx3, (256, 2), jnp.float32)
    out3 = jax.block_until_ready(
        linear_nn_complex_forward(x3, *params, block_rows=128)
    )
    ref3 = reference_forward(x3, *params)
    assert out3.shape == (256, 3), out3.shape
    assert jnp.allclose(out3, ref3, atol=1e-5, rtol=1e-5)

    print("KERNEL_OK")
</pallas_src>

<mosaic_0001>
module attributes {stable_mosaic.version = 11 : i64} {
  func.func @_mlp_kernel(%arg0: i32, %arg1: memref<2x128xf32, #tpu.memory_space<vmem>>, %arg2: memref<2x4xf32, #tpu.memory_space<smem>>, %arg3: memref<1x4xf32, #tpu.memory_space<smem>>, %arg4: memref<4x4xf32, #tpu.memory_space<smem>>, %arg5: memref<1x4xf32, #tpu.memory_space<smem>>, %arg6: memref<4x3xf32, #tpu.memory_space<smem>>, %arg7: memref<1x3xf32, #tpu.memory_space<smem>>, %arg8: memref<3x128xf32, #tpu.memory_space<vmem>>) attributes {dimension_semantics = [#tpu.dimension_semantics<parallel>], iteration_bounds = array<i64: 1>, scalar_prefetch = 0 : i64, scratch_operands = 0 : i64, tpu.core_type = #tpu.core_type<tc>, window_params = [{transform_indices = @transform_0, window_bounds = array<i64: 2, 128>}, {transform_indices = @transform_1, window_bounds = array<i64: 2, 4>}, {transform_indices = @transform_2, window_bounds = array<i64: 1, 4>}, {transform_indices = @transform_3, window_bounds = array<i64: 4, 4>}, {transform_indices = @transform_4, window_bounds = array<i64: 1, 4>}, {transform_indices = @transform_5, window_bounds = array<i64: 4, 3>}, {transform_indices = @transform_6, window_bounds = array<i64: 1, 3>}, {transform_indices = @transform_7, window_bounds = array<i64: 3, 128>}]} {
    %c0 = arith.constant 0 : index
    %c0_0 = arith.constant 0 : index
    %0 = vector.load %arg1[%c0, %c0_0] : memref<2x128xf32, #tpu.memory_space<vmem>>, vector<1x128xf32>
    %c1 = arith.constant 1 : index
    %c0_1 = arith.constant 0 : index
    %1 = vector.load %arg1[%c1, %c0_1] : memref<2x128xf32, #tpu.memory_space<vmem>>, vector<1x128xf32>
    %c0_2 = arith.constant 0 : index
    %c0_3 = arith.constant 0 : index
    %2 = memref.load %arg2[%c0_2, %c0_3] : memref<2x4xf32, #tpu.memory_space<smem>>
    %3 = vector.broadcast %2 : f32 to vector<1x128xf32>
    %4 = arith.mulf %0, %3 : vector<1x128xf32>
    %c1_4 = arith.constant 1 : index
    %c0_5 = arith.constant 0 : index
    %5 = memref.load %arg2[%c1_4, %c0_5] : memref<2x4xf32, #tpu.memory_space<smem>>
    %6 = vector.broadcast %5 : f32 to vector<1x128xf32>
    %7 = arith.mulf %1, %6 : vector<1x128xf32>
    %8 = arith.addf %4, %7 : vector<1x128xf32>
    %c0_6 = arith.constant 0 : index
    %c0_7 = arith.constant 0 : index
    %9 = memref.load %arg3[%c0_6, %c0_7] : memref<1x4xf32, #tpu.memory_space<smem>>
    %10 = vector.broadcast %9 : f32 to vector<1x128xf32>
    %11 = arith.addf %8, %10 : vector<1x128xf32>
    %cst = arith.constant 0.000000e+00 : f32
    %12 = vector.broadcast %cst : f32 to vector<1x128xf32>
    %13 = arith.maximumf %11, %12 : vector<1x128xf32>
    %c0_8 = arith.constant 0 : index
    %c1_9 = arith.constant 1 : index
    %14 = memref.load %arg2[%c0_8, %c1_9] : memref<2x4xf32, #tpu.memory_space<smem>>
    %15 = vector.broadcast %14 : f32 to vector<1x128xf32>
    %16 = arith.mulf %0, %15 : vector<1x128xf32>
    %c1_10 = arith.constant 1 : index
    %c1_11 = arith.constant 1 : index
    %17 = memref.load %arg2[%c1_10, %c1_11] : memref<2x4xf32, #tpu.memory_space<smem>>
    %18 = vector.broadcast %17 : f32 to vector<1x128xf32>
    %19 = arith.mulf %1, %18 : vector<1x128xf32>
    %20 = arith.addf %16, %19 : vector<1x128xf32>
    %c0_12 = arith.constant 0 : index
    %c1_13 = arith.constant 1 : index
    %21 = memref.load %arg3[%c0_12, %c1_13] : memref<1x4xf32, #tpu.memory_space<smem>>
    %22 = vector.broadcast %21 : f32 to vector<1x128xf32>
    %23 = arith.addf %20, %22 : vector<1x128xf32>
    %cst_14 = arith.constant 0.000000e+00 : f32
    %24 = vector.broadcast %cst_14 : f32 to vector<1x128xf32>
    %25 = arith.maximumf %23, %24 : vector<1x128xf32>
    %c0_15 = arith.constant 0 : index
    %c2 = arith.constant 2 : index
    %26 = memref.load %arg2[%c0_15, %c2] : memref<2x4xf32, #tpu.memory_space<smem>>
    %27 = vector.broadcast %26 : f32 to vector<1x128xf32>
    %28 = arith.mulf %0, %27 : vector<1x128xf32>
    %c1_16 = arith.constant 1 : index
    %c2_17 = arith.constant 2 : index
    %29 = memref.load %arg2[%c1_16, %c2_17] : memref<2x4xf32, #tpu.memory_space<smem>>
    %30 = vector.broadcast %29 : f32 to vector<1x128xf32>
    %31 = arith.mulf %1, %30 : vector<1x128xf32>
    %32 = arith.addf %28, %31 : vector<1x128xf32>
    %c0_18 = arith.constant 0 : index
    %c2_19 = arith.constant 2 : index
    %33 = memref.load %arg3[%c0_18, %c2_19] : memref<1x4xf32, #tpu.memory_space<smem>>
    %34 = vector.broadcast %33 : f32 to vector<1x128xf32>
    %35 = arith.addf %32, %34 : vector<1x128xf32>
    %cst_20 = arith.constant 0.000000e+00 : f32
    %36 = vector.broadcast %cst_20 : f32 to vector<1x128xf32>
    %37 = arith.maximumf %35, %36 : vector<1x128xf32>
    %c0_21 = arith.constant 0 : index
    %c3 = arith.constant 3 : index
    %38 = memref.load %arg2[%c0_21, %c3] : memref<2x4xf32, #tpu.memory_space<smem>>
    %39 = vector.broadcast %38 : f32 to vector<1x128xf32>
    %40 = arith.mulf %0, %39 : vector<1x128xf32>
    %c1_22 = arith.constant 1 : index
    %c3_23 = arith.constant 3 : index
    %41 = memref.load %arg2[%c1_22, %c3_23] : memref<2x4xf32, #tpu.memory_space<smem>>
    %42 = vector.broadcast %41 : f32 to vector<1x128xf32>
    %43 = arith.mulf %1, %42 : vector<1x128xf32>
    %44 = arith.addf %40, %43 : vector<1x128xf32>
    %c0_24 = arith.constant 0 : index
    %c3_25 = arith.constant 3 : index
    %45 = memref.load %arg3[%c0_24, %c3_25] : memref<1x4xf32, #tpu.memory_space<smem>>
    %46 = vector.broadcast %45 : f32 to vector<1x128xf32>
    %47 = arith.addf %44, %46 : vector<1x128xf32>
    %cst_26 = arith.constant 0.000000e+00 : f32
    %48 = vector.broadcast %cst_26 : f32 to vector<1x128xf32>
    %49 = arith.maximumf %47, %48 : vector<1x128xf32>
    %c0_27 = arith.constant 0 : index
    %c0_28 = arith.constant 0 : index
    %50 = memref.load %arg4[%c0_27, %c0_28] : memref<4x4xf32, #tpu.memory_space<smem>>
    %51 = vector.broadcast %50 : f32 to vector<1x128xf32>
    %52 = arith.mulf %13, %51 : vector<1x128xf32>
    %c1_29 = arith.constant 1 : index
    %c0_30 = arith.constant 0 : index
    %53 = memref.load %arg4[%c1_29, %c0_30] : memref<4x4xf32, #tpu.memory_space<smem>>
    %54 = vector.broadcast %53 : f32 to vector<1x128xf32>
    %55 = arith.mulf %25, %54 : vector<1x128xf32>
    %56 = arith.addf %52, %55 : vector<1x128xf32>
    %c2_31 = arith.constant 2 : index
    %c0_32 = arith.constant 0 : index
    %57 = memref.load %arg4[%c2_31, %c0_32] : memref<4x4xf32, #tpu.memory_space<smem>>
    %58 = vector.broadcast %57 : f32 to vector<1x128xf32>
    %59 = arith.mulf %37, %58 : vector<1x128xf32>
    %60 = arith.addf %56, %59 : vector<1x128xf32>
    %c3_33 = arith.constant 3 : index
    %c0_34 = arith.constant 0 : index
    %61 = memref.load %arg4[%c3_33, %c0_34] : memref<4x4xf32, #tpu.memory_space<smem>>
    %62 = vector.broadcast %61 : f32 to vector<1x128xf32>
    %63 = arith.mulf %49, %62 : vector<1x128xf32>
    %64 = arith.addf %60, %63 : vector<1x128xf32>
    %c0_35 = arith.constant 0 : index
    %c0_36 = arith.constant 0 : index
    %65 = memref.load %arg5[%c0_35, %c0_36] : memref<1x4xf32, #tpu.memory_space<smem>>
    %66 = vector.broadcast %65 : f32 to vector<1x128xf32>
    %67 = arith.addf %64, %66 : vector<1x128xf32>
    %cst_37 = arith.constant 0.000000e+00 : f32
    %68 = vector.broadcast %cst_37 : f32 to vector<1x128xf32>
    %69 = arith.maximumf %67, %68 : vector<1x128xf32>
    %c0_38 = arith.constant 0 : index
    %c1_39 = arith.constant 1 : index
    %70 = memref.load %arg4[%c0_38, %c1_39] : memref<4x4xf32, #tpu.memory_space<smem>>
    %71 = vector.broadcast %70 : f32 to vector<1x128xf32>
    %72 = arith.mulf %13, %71 : vector<1x128xf32>
    %c1_40 = arith.constant 1 : index
    %c1_41 = arith.constant 1 : index
    %73 = memref.load %arg4[%c1_40, %c1_41] : memref<4x4xf32, #tpu.memory_space<smem>>
    %74 = vector.broadcast %73 : f32 to vector<1x128xf32>
    %75 = arith.mulf %25, %74 : vector<1x128xf32>
    %76 = arith.addf %72, %75 : vector<1x128xf32>
    %c2_42 = arith.constant 2 : index
    %c1_43 = arith.constant 1 : index
    %77 = memref.load %arg4[%c2_42, %c1_43] : memref<4x4xf32, #tpu.memory_space<smem>>
    %78 = vector.broadcast %77 : f32 to vector<1x128xf32>
    %79 = arith.mulf %37, %78 : vector<1x128xf32>
    %80 = arith.addf %76, %79 : vector<1x128xf32>
    %c3_44 = arith.constant 3 : index
    %c1_45 = arith.constant 1 : index
    %81 = memref.load %arg4[%c3_44, %c1_45] : memref<4x4xf32, #tpu.memory_space<smem>>
    %82 = vector.broadcast %81 : f32 to vector<1x128xf32>
    %83 = arith.mulf %49, %82 : vector<1x128xf32>
    %84 = arith.addf %80, %83 : vector<1x128xf32>
    %c0_46 = arith.constant 0 : index
    %c1_47 = arith.constant 1 : index
    %85 = memref.load %arg5[%c0_46, %c1_47] : memref<1x4xf32, #tpu.memory_space<smem>>
    %86 = vector.broadcast %85 : f32 to vector<1x128xf32>
    %87 = arith.addf %84, %86 : vector<1x128xf32>
    %cst_48 = arith.constant 0.000000e+00 : f32
    %88 = vector.broadcast %cst_48 : f32 to vector<1x128xf32>
    %89 = arith.maximumf %87, %88 : vector<1x128xf32>
    %c0_49 = arith.constant 0 : index
    %c2_50 = arith.constant 2 : index
    %90 = memref.load %arg4[%c0_49, %c2_50] : memref<4x4xf32, #tpu.memory_space<smem>>
    %91 = vector.broadcast %90 : f32 to vector<1x128xf32>
    %92 = arith.mulf %13, %91 : vector<1x128xf32>
    %c1_51 = arith.constant 1 : index
    %c2_52 = arith.constant 2 : index
    %93 = memref.load %arg4[%c1_51, %c2_52] : memref<4x4xf32, #tpu.memory_space<smem>>
    %94 = vector.broadcast %93 : f32 to vector<1x128xf32>
    %95 = arith.mulf %25, %94 : vector<1x128xf32>
    %96 = arith.addf %92, %95 : vector<1x128xf32>
    %c2_53 = arith.constant 2 : index
    %c2_54 = arith.constant 2 : index
    %97 = memref.load %arg4[%c2_53, %c2_54] : memref<4x4xf32, #tpu.memory_space<smem>>
    %98 = vector.broadcast %97 : f32 to vector<1x128xf32>
    %99 = arith.mulf %37, %98 : vector<1x128xf32>
    %100 = arith.addf %96, %99 : vector<1x128xf32>
    %c3_55 = arith.constant 3 : index
    %c2_56 = arith.constant 2 : index
    %101 = memref.load %arg4[%c3_55, %c2_56] : memref<4x4xf32, #tpu.memory_space<smem>>
    %102 = vector.broadcast %101 : f32 to vector<1x128xf32>
    %103 = arith.mulf %49, %102 : vector<1x128xf32>
    %104 = arith.addf %100, %103 : vector<1x128xf32>
    %c0_57 = arith.constant 0 : index
    %c2_58 = arith.constant 2 : index
    %105 = memref.load %arg5[%c0_57, %c2_58] : memref<1x4xf32, #tpu.memory_space<smem>>
    %106 = vector.broadcast %105 : f32 to vector<1x128xf32>
    %107 = arith.addf %104, %106 : vector<1x128xf32>
    %cst_59 = arith.constant 0.000000e+00 : f32
    %108 = vector.broadcast %cst_59 : f32 to vector<1x128xf32>
    %109 = arith.maximumf %107, %108 : vector<1x128xf32>
    %c0_60 = arith.constant 0 : index
    %c3_61 = arith.constant 3 : index
    %110 = memref.load %arg4[%c0_60, %c3_61] : memref<4x4xf32, #tpu.memory_space<smem>>
    %111 = vector.broadcast %110 : f32 to vector<1x128xf32>
    %112 = arith.mulf %13, %111 : vector<1x128xf32>
    %c1_62 = arith.constant 1 : index
    %c3_63 = arith.constant 3 : index
    %113 = memref.load %arg4[%c1_62, %c3_63] : memref<4x4xf32, #tpu.memory_space<smem>>
    %114 = vector.broadcast %113 : f32 to vector<1x128xf32>
    %115 = arith.mulf %25, %114 : vector<1x128xf32>
    %116 = arith.addf %112, %115 : vector<1x128xf32>
    %c2_64 = arith.constant 2 : index
    %c3_65 = arith.constant 3 : index
    %117 = memref.load %arg4[%c2_64, %c3_65] : memref<4x4xf32, #tpu.memory_space<smem>>
    %118 = vector.broadcast %117 : f32 to vector<1x128xf32>
    %119 = arith.mulf %37, %118 : vector<1x128xf32>
    %120 = arith.addf %116, %119 : vector<1x128xf32>
    %c3_66 = arith.constant 3 : index
    %c3_67 = arith.constant 3 : index
    %121 = memref.load %arg4[%c3_66, %c3_67] : memref<4x4xf32, #tpu.memory_space<smem>>
    %122 = vector.broadcast %121 : f32 to vector<1x128xf32>
    %123 = arith.mulf %49, %122 : vector<1x128xf32>
    %124 = arith.addf %120, %123 : vector<1x128xf32>
    %c0_68 = arith.constant 0 : index
    %c3_69 = arith.constant 3 : index
    %125 = memref.load %arg5[%c0_68, %c3_69] : memref<1x4xf32, #tpu.memory_space<smem>>
    %126 = vector.broadcast %125 : f32 to vector<1x128xf32>
    %127 = arith.addf %124, %126 : vector<1x128xf32>
    %cst_70 = arith.constant 0.000000e+00 : f32
    %128 = vector.broadcast %cst_70 : f32 to vector<1x128xf32>
    %129 = arith.maximumf %127, %128 : vector<1x128xf32>
    %c0_71 = arith.constant 0 : index
    %c0_72 = arith.constant 0 : index
    %130 = memref.load %arg6[%c0_71, %c0_72] : memref<4x3xf32, #tpu.memory_space<smem>>
    %131 = vector.broadcast %130 : f32 to vector<1x128xf32>
    %132 = arith.mulf %69, %131 : vector<1x128xf32>
    %c1_73 = arith.constant 1 : index
    %c0_74 = arith.constant 0 : index
    %133 = memref.load %arg6[%c1_73, %c0_74] : memref<4x3xf32, #tpu.memory_space<smem>>
    %134 = vector.broadcast %133 : f32 to vector<1x128xf32>
    %135 = arith.mulf %89, %134 : vector<1x128xf32>
    %136 = arith.addf %132, %135 : vector<1x128xf32>
    %c2_75 = arith.constant 2 : index
    %c0_76 = arith.constant 0 : index
    %137 = memref.load %arg6[%c2_75, %c0_76] : memref<4x3xf32, #tpu.memory_space<smem>>
    %138 = vector.broadcast %137 : f32 to vector<1x128xf32>
    %139 = arith.mulf %109, %138 : vector<1x128xf32>
    %140 = arith.addf %136, %139 : vector<1x128xf32>
    %c3_77 = arith.constant 3 : index
    %c0_78 = arith.constant 0 : index
    %141 = memref.load %arg6[%c3_77, %c0_78] : memref<4x3xf32, #tpu.memory_space<smem>>
    %142 = vector.broadcast %141 : f32 to vector<1x128xf32>
    %143 = arith.mulf %129, %142 : vector<1x128xf32>
    %144 = arith.addf %140, %143 : vector<1x128xf32>
    %c0_79 = arith.constant 0 : index
    %c0_80 = arith.constant 0 : index
    %145 = memref.load %arg7[%c0_79, %c0_80] : memref<1x3xf32, #tpu.memory_space<smem>>
    %146 = vector.broadcast %145 : f32 to vector<1x128xf32>
    %147 = arith.addf %144, %146 : vector<1x128xf32>
    %c0_81 = arith.constant 0 : index
    %c0_82 = arith.constant 0 : index
    %148 = vector.load %arg8[%c0_81, %c0_82] : memref<3x128xf32, #tpu.memory_space<vmem>>, vector<1x128xf32>
    tpu.vector_store %arg8[%c0_81, %c0_82], %147 {strides = array<i32>} : memref<3x128xf32, #tpu.memory_space<vmem>>, vector<1x128xf32>,
    %c0_83 = arith.constant 0 : index
    %c1_84 = arith.constant 1 : index
    %149 = memref.load %arg6[%c0_83, %c1_84] : memref<4x3xf32, #tpu.memory_space<smem>>
    %150 = vector.broadcast %149 : f32 to vector<1x128xf32>
    %151 = arith.mulf %69, %150 : vector<1x128xf32>
    %c1_85 = arith.constant 1 : index
    %c1_86 = arith.constant 1 : index
    %152 = memref.load %arg6[%c1_85, %c1_86] : memref<4x3xf32, #tpu.memory_space<smem>>
    %153 = vector.broadcast %152 : f32 to vector<1x128xf32>
    %154 = arith.mulf %89, %153 : vector<1x128xf32>
    %155 = arith.addf %151, %154 : vector<1x128xf32>
    %c2_87 = arith.constant 2 : index
    %c1_88 = arith.constant 1 : index
    %156 = memref.load %arg6[%c2_87, %c1_88] : memref<4x3xf32, #tpu.memory_space<smem>>
    %157 = vector.broadcast %156 : f32 to vector<1x128xf32>
    %158 = arith.mulf %109, %157 : vector<1x128xf32>
    %159 = arith.addf %155, %158 : vector<1x128xf32>
    %c3_89 = arith.constant 3 : index
    %c1_90 = arith.constant 1 : index
    %160 = memref.load %arg6[%c3_89, %c1_90] : memref<4x3xf32, #tpu.memory_space<smem>>
    %161 = vector.broadcast %160 : f32 to vector<1x128xf32>
    %162 = arith.mulf %129, %161 : vector<1x128xf32>
    %163 = arith.addf %159, %162 : vector<1x128xf32>
    %c0_91 = arith.constant 0 : index
    %c1_92 = arith.constant 1 : index
    %164 = memref.load %arg7[%c0_91, %c1_92] : memref<1x3xf32, #tpu.memory_space<smem>>
    %165 = vector.broadcast %164 : f32 to vector<1x128xf32>
    %166 = arith.addf %163, %165 : vector<1x128xf32>
    %c1_93 = arith.constant 1 : index
    %c0_94 = arith.constant 0 : index
    %167 = vector.load %arg8[%c1_93, %c0_94] : memref<3x128xf32, #tpu.memory_space<vmem>>, vector<1x128xf32>
    tpu.vector_store %arg8[%c1_93, %c0_94], %166 {strides = array<i32>} : memref<3x128xf32, #tpu.memory_space<vmem>>, vector<1x128xf32>,
    %c0_95 = arith.constant 0 : index
    %c2_96 = arith.constant 2 : index
    %168 = memref.load %arg6[%c0_95, %c2_96] : memref<4x3xf32, #tpu.memory_space<smem>>
    %169 = vector.broadcast %168 : f32 to vector<1x128xf32>
    %170 = arith.mulf %69, %169 : vector<1x128xf32>
    %c1_97 = arith.constant 1 : index
    %c2_98 = arith.constant 2 : index
    %171 = memref.load %arg6[%c1_97, %c2_98] : memref<4x3xf32, #tpu.memory_space<smem>>
    %172 = vector.broadcast %171 : f32 to vector<1x128xf32>
    %173 = arith.mulf %89, %172 : vector<1x128xf32>
    %174 = arith.addf %170, %173 : vector<1x128xf32>
    %c2_99 = arith.constant 2 : index
    %c2_100 = arith.constant 2 : index
    %175 = memref.load %arg6[%c2_99, %c2_100] : memref<4x3xf32, #tpu.memory_space<smem>>
    %176 = vector.broadcast %175 : f32 to vector<1x128xf32>
    %177 = arith.mulf %109, %176 : vector<1x128xf32>
    %178 = arith.addf %174, %177 : vector<1x128xf32>
    %c3_101 = arith.constant 3 : index
    %c2_102 = arith.constant 2 : index
    %179 = memref.load %arg6[%c3_101, %c2_102] : memref<4x3xf32, #tpu.memory_space<smem>>
    %180 = vector.broadcast %179 : f32 to vector<1x128xf32>
    %181 = arith.mulf %129, %180 : vector<1x128xf32>
    %182 = arith.addf %178, %181 : vector<1x128xf32>
    %c0_103 = arith.constant 0 : index
    %c2_104 = arith.constant 2 : index
    %183 = memref.load %arg7[%c0_103, %c2_104] : memref<1x3xf32, #tpu.memory_space<smem>>
    %184 = vector.broadcast %183 : f32 to vector<1x128xf32>
    %185 = arith.addf %182, %184 : vector<1x128xf32>
    %c2_105 = arith.constant 2 : index
    %c0_106 = arith.constant 0 : index
    %186 = vector.load %arg8[%c2_105, %c0_106] : memref<3x128xf32, #tpu.memory_space<vmem>>, vector<1x128xf32>
    tpu.vector_store %arg8[%c2_105, %c0_106], %185 {strides = array<i32>} : memref<3x128xf32, #tpu.memory_space<vmem>>, vector<1x128xf32>,
    return
  }
  func.func @transform_0(%arg0: i32) -> (i32, i32) {
    %c0_i32 = arith.constant 0 : i32
    %c0_i32_0 = arith.constant 0 : i32
    return %c0_i32, %arg0 : i32, i32
  }
  func.func @transform_1(%arg0: i32) -> (i32, i32) {
    %c0_i32 = arith.constant 0 : i32
    %c0_i32_0 = arith.constant 0 : i32
    %c0_i32_1 = arith.constant 0 : i32
    return %c0_i32, %c0_i32_0 : i32, i32
  }
  func.func @transform_2(%arg0: i32) -> (i32, i32) {
    %c0_i32 = arith.constant 0 : i32
    %c0_i32_0 = arith.constant 0 : i32
    %c0_i32_1 = arith.constant 0 : i32
    return %c0_i32, %c0_i32_0 : i32, i32
  }
  func.func @transform_3(%arg0: i32) -> (i32, i32) {
    %c0_i32 = arith.constant 0 : i32
    %c0_i32_0 = arith.constant 0 : i32
    %c0_i32_1 = arith.constant 0 : i32
    return %c0_i32, %c0_i32_0 : i32, i32
  }
  func.func @transform_4(%arg0: i32) -> (i32, i32) {
    %c0_i32 = arith.constant 0 : i32
    %c0_i32_0 = arith.constant 0 : i32
    %c0_i32_1 = arith.constant 0 : i32
    return %c0_i32, %c0_i32_0 : i32, i32
  }
  func.func @transform_5(%arg0: i32) -> (i32, i32) {
    %c0_i32 = arith.constant 0 : i32
    %c0_i32_0 = arith.constant 0 : i32
    %c0_i32_1 = arith.constant 0 : i32
    return %c0_i32, %c0_i32_0 : i32, i32
  }
  func.func @transform_6(%arg0: i32) -> (i32, i32) {
    %c0_i32 = arith.constant 0 : i32
    %c0_i32_0 = arith.constant 0 : i32
    %c0_i32_1 = arith.constant 0 : i32
    return %c0_i32, %c0_i32_0 : i32, i32
  }
  func.func @transform_7(%arg0: i32) -> (i32, i32) {
    %c0_i32 = arith.constant 0 : i32
    %c0_i32_0 = arith.constant 0 : i32
    return %c0_i32, %arg0 : i32, i32
  }
}

</mosaic_0001>

<bundles_post_ra>
// kernel: linear_nn_complex_forward.1
= control target key start
LH: loop header
LB: loop body
LE: loop exit
PB: predicated region body
PF: predicated region fallthrough
CT: control target
= control target key end

     0   :  { %12 = vsyncpa [#allocation4], 0  ;;  %s567_s0 = inlined_call_operand.vmem [shape: f32[2,128], index: 0, kind: input, shape index: {}]   ;;  %s568_s1 = inlined_call_operand.hbm [shape: f32[2,4], index: 1, kind: input, shape index: {}]   ;;  %s569_s2 = inlined_call_operand.vmem [shape: f32[1,4], index: 2, kind: input, shape index: {}]   ;;  %s570_s3 = inlined_call_operand.vmem [shape: f32[4,4], index: 3, kind: input, shape index: {}]   ;;  %s571_s4 = inlined_call_operand.vmem [shape: f32[1,4], index: 4, kind: input, shape index: {}]   ;;  %s572_s5 = inlined_call_operand.vmem [shape: f32[4,3], index: 5, kind: input, shape index: {}]   ;;  %s573_s6 = inlined_call_operand.vmem [shape: f32[1,3], index: 6, kind: input, shape index: {}]   ;;  %s574_s7 = inlined_call_operand.hbm [shape: f32[3,128], index: 7, kind: output, shape index: {}]  }
   0x1   :  { %13 = vsyncpa [#allocation5], 0 }
   0x2   :  { %14 = vsyncpa [#allocation8], 0 }
   0x3   :  { %15 = vsyncpa [#allocation11], 0  ;;  %s42_s26 = sshll.u32 %s570_s3, 4  ;;  %s43_s26 = int_to_ptr.vmem [resolvable:$true] %s42_s26 }
   0x4   :  { %16 = vsyncpa [#allocation3], 0  ;;  %s60_s29 = sshll.u32 %s572_s5, 4  ;;  %s451_s30 = smov [#allocation7]   ;;  %s61_s29 = int_to_ptr.vmem [resolvable:$true] %s60_s29 }
   0x5   :  { %45 = dma.vmem_to_smem %s43_s26, 64, %s451_s30, [#allocation8]  }
   0x6   :  { %s452_s8 = smov [#allocation10]   ;;  %s24_s11 = sshll.u32 %s568_s1, 4  ;;  %s25_s11 = int_to_ptr.hbm [resolvable:$true] %s24_s11 }
   0x7   :  { %63 = dma.vmem_to_smem %s61_s29, 64, %s452_s8, [#allocation11]  }
   0x8   :  { %s33_s3 = sshll.u32 %s569_s2, 4  ;;  %s453_s14 = smov [#allocation2]   ;;  %s34_s3 = int_to_ptr.vmem [resolvable:$true] %s33_s3 }
   0x9   :  { %27 = dma.hbm_to_smem %s25_s11, 32, %s453_s14, [#allocation4]  }
   0xa   :  { %s454_s15 = smov [#allocation6]   ;;  %s51_s17 = sshll.u32 %s571_s4, 4  ;;  %s52_s17 = int_to_ptr.vmem [resolvable:$true] %s51_s17 }
   0xb   :  { %36 = dma.vmem_to_smem %s34_s3, 16, %s454_s15, [#allocation5]  }
   0xc   :  { %s69_s20 = sshll.u32 %s573_s6, 4  ;;  %s455_s1 = smov [#allocation9]   ;;  %s70_s20 = int_to_ptr.vmem [resolvable:$true] %s69_s20 }
   0xd   :  { %54 = dma.vmem_to_smem %s52_s17, 16, %s455_s1, [#allocation8]  }
   0xe   :  { %s456_s21 = smov [#allocation12]  }
   0xf   :  { %72 = dma.vmem_to_smem %s70_s20, 16, %s456_s21, [#allocation11]  }
  0x10   :  { %441 = dma.done.wait [#allocation4], 32  }
  0x11   :  { %442 = vsyncadd [#allocation4], 4294967264 }
  0x12   :  { %443 = dma.done.wait [#allocation5], 16  }
  0x13   :  { %444 = vsyncadd [#allocation5], 4294967280 }
  0x14   :  { %445 = dma.done.wait [#allocation8], 80  }
  0x15   :  { %446 = vsyncadd [#allocation8], 4294967216 }
  0x16   :  { %447 = dma.done.wait [#allocation11], 80  }
  0x17   :  { %448 = vsyncadd [#allocation11], 4294967216 }
  0x18   :  { %97 = sfence }
  0x19   :  { %s100_s2 = sld [smem:[#allocation2]]  ;;  %v98_v0 = vld [vmem:[%s567_s0] sm:$0x1]  ;;  %v99_v1 = vld [vmem:[%s567_s0 + $0x1] sm:$0x1] }
  0x1a   :  { %s297_s4 = sld [smem:[#allocation2 + $0x80]] }
  0x1b   :  { %s107_s22 = sld [smem:[#allocation6]] }
  0x1c   :  { %s298_s23 = sld [smem:[#allocation2 + $0x1]] }
  0x1d   :  { %s299_s25 = sld [smem:[#allocation2 + $0x81]] }
  0x1e   :  { %s300_s28 = sld [smem:[#allocation6 + $0x1]] }
  0x1f   :  { %v101_v2 = vstv %s100_s2  ;;  %s301_s29 = sld [smem:[#allocation2 + $0x2]] }
  0x20   :  { %v102_v3 = vmul.f32 %v101_v2, %v98_v0  ;;  %v104_v4 = vstv %s297_s4  ;;  %s302_s30 = sld [smem:[#allocation2 + $0x82]] }
  0x21   :  { %v105_v5 = vmul.f32 %v104_v4, %v99_v1  ;;  %s522_s8 = sld [smem:[#allocation6 + $0x2]]  ;;  %v108_v6 = vstv %s107_s22 }
  0x22   :  { %v112_v7 = vstv %s298_s23  ;;  %s304_s9 = sld [smem:[#allocation2 + $0x3]] }
  0x23   :  { %v106_v8 = vadd.f32 %v105_v5, %v102_v3  ;;  %v113_v9 = vmul.f32 %v112_v7, %v98_v0  ;;  %v115_v10 = vstv %s299_s25  ;;  %s305_s10 = sld [smem:[#allocation2 + $0x83]] }
  0x24   :  { %v116_v11 = vmul.f32 %v115_v10, %v99_v1  ;;  %s524_s11 = sld [smem:[#allocation6 + $0x3]]  ;;  %v119_v13 = vstv %s300_s28 }
  0x25   :  { %v109_v12 = vadd.f32 %v108_v6, %v106_v8  ;;  %v123_v14 = vstv %s301_s29  ;;  %s144_s0 = sld [smem:[#allocation7]] }
  0x26   :  { %v117_v15 = vadd.f32 %v116_v11, %v113_v9  ;;  %v124_v16 = vmul.f32 %v123_v14, %v98_v0  ;;  %v126_v17 = vstv %s302_s30  ;;  %s307_s12 = sld [smem:[#allocation7 + $0x80]] }
  0x27   :  { %v127_v18 = vmul.f32 %v126_v17, %v99_v1  ;;  %s308_s13 = sld [smem:[#allocation7 + $0x100]]  ;;  %v526_v19 = vmax.f32 %v109_v12, 0.0  ;;  %v130_v21 = vstv %s522_s8 }
  0x28   :  { %v120_v20 = vadd.f32 %v119_v13, %v117_v15  ;;  %v134_v22 = vstv %s304_s9  ;;  %s529_s3 = sld [smem:[#allocation7 + $0x180]] }
  0x29   :  { %v128_v23 = vadd.f32 %v127_v18, %v124_v16  ;;  %v135_v24 = vmul.f32 %v134_v22, %v98_v0  ;;  %v137_v25 = vstv %s305_s10  ;;  %s531_s14 = sld [smem:[#allocation9]] }
  0x2a   :  { %v533_v26 = vmax.f32 %v120_v20, 0.0  ;;  %v138_v27 = vmul.f32 %v137_v25, %v99_v1  ;;  %s310_s15 = sld [smem:[#allocation7 + $0x1]]  ;;  %v141_v29 = vstv %s524_s11 }
  0x2b   :  { %v131_v28 = vadd.f32 %v130_v21, %v128_v23  ;;  %v145_v30 = vstv %s144_s0  ;;  %s311_s5 = sld [smem:[#allocation7 + $0x81]] }
  0x2c   :  { %v139_v31 = vadd.f32 %v138_v27, %v135_v24  ;;  %v146_v32 = vmul.f32 %v145_v30, %v526_v19  ;;  %v148_v33 = vstv %s307_s12  ;;  %s312_s16 = sld [smem:[#allocation7 + $0x101]] }
  0x2d   :  { %v132_v34 = vmax.f32 %v131_v28, 0.0  ;;  %v149_v35 = vmul.f32 %v148_v33, %v533_v26  ;;  %v152_v36 = vstv %s308_s13  ;;  %s313_s17 = sld [smem:[#allocation7 + $0x181]] }
  0x2e   :  { %v142_v37 = vadd.f32 %v141_v29, %v139_v31  ;;  %s538_s18 = sld [smem:[#allocation9 + $0x1]]  ;;  %v156_v40 = vstv %s529_s3 }
  0x2f   :  { %v150_v38 = vadd.f32 %v149_v35, %v146_v32  ;;  %v153_v39 = vmul.f32 %v152_v36, %v132_v34  ;;  %s315_s19 = sld [smem:[#allocation7 + $0x2]]  ;;  %v160_v54 = vstv %s531_s14 }
  0x30   :  { %v143_v41 = vmax.f32 %v142_v37, 0.0  ;;  %v164_v42 = vstv %s310_s15  ;;  %s316_s20 = sld [smem:[#allocation7 + $0x82]]  ;;  %s457_s15 = smov [#allocation13]  }
  0x31   :  { %v154_v43 = vadd.f32 %v153_v39, %v150_v38  ;;  %v165_v44 = vmul.f32 %v164_v42, %v526_v19  ;;  %v167_v45 = vstv %s311_s5  ;;  %s317_s1 = sld [smem:[#allocation7 + $0x102]]  ;;  %s282_s5 = sshll.u32 %s457_s15, 4  ;;  %s283_s5 = int_to_ptr.vmem [resolvable:$true] %s282_s5 }
  0x32   :  { %v157_v46 = vmul.f32 %v156_v40, %v143_v41  ;;  %v168_v47 = vmul.f32 %v167_v45, %v533_v26  ;;  %v171_v48 = vstv %s312_s16  ;;  %s318_s21 = sld [smem:[#allocation7 + $0x182]] }
  0x33   :  { %v172_v49 = vmul.f32 %v171_v48, %v132_v34  ;;  %v175_v50 = vstv %s313_s17  ;;  %s543_s2 = sld [smem:[#allocation9 + $0x2]] }
  0x34   :  { %v158_v51 = vadd.f32 %v157_v46, %v154_v43  ;;  %v169_v52 = vadd.f32 %v168_v47, %v165_v44  ;;  %v176_v53 = vmul.f32 %v175_v50, %v143_v41  ;;  %s320_s4 = sld [smem:[#allocation7 + $0x3]]  ;;  %v179_v59 = vstv %s538_s18  ;;  %s284_s18 = sshll.u32 %s574_s7, 4  ;;  %s285_s18 = int_to_ptr.hbm [resolvable:$true] %s284_s18 }
  0x35   :  { %v183_v55 = vstv %s315_s19  ;;  %s321_s22 = sld [smem:[#allocation7 + $0x83]] }
  0x36   :  { %v173_v56 = vadd.f32 %v172_v49, %v169_v52  ;;  %v184_v57 = vmul.f32 %v183_v55, %v526_v19  ;;  %v186_v58 = vstv %s316_s20  ;;  %s322_s23 = sld [smem:[#allocation7 + $0x103]]  ;;  %v161_v62 = vadd.f32 %v160_v54, %v158_v51 }
  0x37   :  { %v187_v60 = vmul.f32 %v186_v58, %v533_v26  ;;  %v190_v61 = vstv %s317_s1  ;;  %s323_s24 = sld [smem:[#allocation7 + $0x183]] }
  0x38   :  { %v177_v63 = vadd.f32 %v176_v53, %v173_v56  ;;  %v191_v0 = vmul.f32 %v190_v61, %v132_v34  ;;  %v194_v1 = vstv %s318_s21  ;;  %s549_s6 = sld [smem:[#allocation9 + $0x3]]  ;;  %v162_v9 = vmax.f32 %v161_v62, 0.0 }
  0x39   :  { %v188_v2 = vadd.f32 %v187_v60, %v184_v57  ;;  %v195_v3 = vmul.f32 %v194_v1, %v143_v41  ;;  %s220_s25 = sld [smem:[#allocation10]]  ;;  %v198_v10 = vstv %s543_s2 }
  0x3a   :  { %v180_v4 = vadd.f32 %v179_v59, %v177_v63  ;;  %v202_v5 = vstv %s320_s4  ;;  %s325_s26 = sld [smem:[#allocation10 + $0x80]] }
  0x3b   :  { %v192_v6 = vadd.f32 %v191_v0, %v188_v2  ;;  %v203_v7 = vmul.f32 %v202_v5, %v526_v19  ;;  %v205_v8 = vstv %s321_s22  ;;  %s326_s27 = sld [smem:[#allocation10 + $0x100]] }
  0x3c   :  { %v206_v11 = vmul.f32 %v205_v8, %v533_v26  ;;  %v209_v12 = vstv %s322_s23  ;;  %s554_s28 = sld [smem:[#allocation10 + $0x180]]  ;;  %v181_v13 = vmax.f32 %v180_v4, 0.0 }
  0x3d   :  { %v196_v14 = vadd.f32 %v195_v3, %v192_v6  ;;  %v210_v15 = vmul.f32 %v209_v12, %v132_v34  ;;  %v213_v16 = vstv %s323_s24  ;;  %s556_s29 = sld [smem:[#allocation12]] }
  0x3e   :  { %v207_v17 = vadd.f32 %v206_v11, %v203_v7  ;;  %v214_v18 = vmul.f32 %v213_v16, %v143_v41  ;;  %s328_s30 = sld [smem:[#allocation10 + $0x1]]  ;;  %v217_v25 = vstv %s549_s6 }
  0x3f   :  { %v199_v19 = vadd.f32 %v198_v10, %v196_v14  ;;  %v221_v20 = vstv %s220_s25  ;;  %s329_s8 = sld [smem:[#allocation10 + $0x81]] }
  0x40   :  { %v211_v21 = vadd.f32 %v210_v15, %v207_v17  ;;  %v222_v22 = vmul.f32 %v221_v20, %v162_v9  ;;  %v224_v23 = vstv %s325_s26  ;;  %s330_s9 = sld [smem:[#allocation10 + $0x101]] }
  0x41   :  { %v200_v24 = vmax.f32 %v199_v19, 0.0  ;;  %v225_v26 = vmul.f32 %v224_v23, %v181_v13  ;;  %v228_v27 = vstv %s326_s27  ;;  %s331_s10 = sld [smem:[#allocation10 + $0x181]] }
  0x42   :  { %v215_v28 = vadd.f32 %v214_v18, %v211_v21  ;;  %s559_s11 = sld [smem:[#allocation12 + $0x1]]  ;;  %v232_v33 = vstv %s554_s28 }
  0x43   :  { %v226_v29 = vadd.f32 %v225_v26, %v222_v22  ;;  %v229_v30 = vmul.f32 %v228_v27, %v200_v24  ;;  %s333_s0 = sld [smem:[#allocation10 + $0x2]]  ;;  %v236_v45 = vstv %s556_s29 }
  0x44   :  { %v218_v31 = vadd.f32 %v217_v25, %v215_v28  ;;  %v240_v32 = vstv %s328_s30  ;;  %s334_s12 = sld [smem:[#allocation10 + $0x82]] }
  0x45   :  { %v241_v34 = vmul.f32 %v240_v32, %v162_v9  ;;  %v243_v35 = vstv %s329_s8  ;;  %s335_s13 = sld [smem:[#allocation10 + $0x102]]  ;;  %v230_v37 = vadd.f32 %v229_v30, %v226_v29 }
  0x46   :  { %v219_v36 = vmax.f32 %v218_v31, 0.0  ;;  %v244_v38 = vmul.f32 %v243_v35, %v181_v13  ;;  %v247_v39 = vstv %s330_s9  ;;  %s336_s3 = sld [smem:[#allocation10 + $0x182]] }
  0x47   :  { %v248_v40 = vmul.f32 %v247_v39, %v200_v24  ;;  %v251_v41 = vstv %s331_s10  ;;  %s337_s14 = sld [smem:[#allocation12 + $0x2]] }
  0x48   :  { %v233_v42 = vmul.f32 %v232_v33, %v219_v36  ;;  %v245_v43 = vadd.f32 %v244_v38, %v241_v34  ;;  %v252_v44 = vmul.f32 %v251_v41, %v219_v36  ;;  %v255_v51 = vstv %s559_s11 }
  0x49   :  { %v259_v46 = vstv %s333_s0 }
  0x4a   :  { %v234_v47 = vadd.f32 %v233_v42, %v230_v37  ;;  %v249_v48 = vadd.f32 %v248_v40, %v245_v43  ;;  %v260_v49 = vmul.f32 %v259_v46, %v162_v9  ;;  %v262_v50 = vstv %s334_s12 }
  0x4b   :  { %v263_v52 = vmul.f32 %v262_v50, %v181_v13  ;;  %v266_v53 = vstv %s335_s13 }
  0x4c   :  { %v237_v54 = vadd.f32 %v236_v45, %v234_v47  ;;  %v253_v55 = vadd.f32 %v252_v44, %v249_v48  ;;  %v267_v56 = vmul.f32 %v266_v53, %v200_v24  ;;  %v270_v57 = vstv %s336_s3 }
  0x4d   :  { %v264_v58 = vadd.f32 %v263_v52, %v260_v49  ;;  %v271_v59 = vmul.f32 %v270_v57, %v219_v36  ;;  %v274_v62 = vstv %s337_s14 }
  0x4e   :  { %238 = vst [vmem:[#allocation13] sm:$0x1] %v237_v54  ;;  %v256_v60 = vadd.f32 %v255_v51, %v253_v55 }
  0x4f   :  { %v268_v61 = vadd.f32 %v267_v56, %v264_v58 }
  0x50   :  { %257 = vst [vmem:[#allocation13 + $0x1] sm:$0x1] %v256_v60 }
  0x51   :  { %v272_v63 = vadd.f32 %v271_v59, %v268_v61 }
  0x53   :  { %v275_v0 = vadd.f32 %v274_v62, %v272_v63 }
  0x55   :  { %276 = vst [vmem:[#allocation13 + $0x2] sm:$0x1] %v275_v0 }
  0x56   :  { %287 = dma.vmem_to_hbm [thread:$0]  %s283_s5, 64, %s285_s18, [#allocation3]  }
  0x57   :  { %449 = dma.done.wait [#allocation3], 64  }
  0x58   :  { %450 = vsyncadd [#allocation3], 4294967232 }
  0x59   :  { %292 = vsyncpa [#allocation3], 1 }
  0x5a   :  { %293 = vsyncpa [#allocation4], 1 }
  0x5b   :  { %294 = vsyncpa [#allocation5], 1 }
  0x5c   :  { %295 = vsyncpa [#allocation8], 1 }
  0x5d   :  { %296 = vsyncpa [#allocation11], 1 }

</bundles_post_ra>
